<compile_context>
chip_gen: v7x
topology: tpu7x:2x2x1
jax: 0.10.0
libtpu: 0.0.40
codegen_flags: <defaults>
</compile_context>

<pallas_src>
import functools

import jax
import jax.numpy as jnp
from jax import lax
from jax.experimental import pallas as pl
from jax.experimental.pallas import tpu as pltpu


# --------------------------------------------------------------------------
# shared per-tile focal-loss math
# --------------------------------------------------------------------------
def _focal_tile(x, t, alpha, gamma):
    x = x.astype(jnp.float32)
    t = t.astype(jnp.float32)
    # Numerically stable BCE-with-logits (same formula PyTorch uses):
    #   bce = max(x, 0) - x*t + log1p(exp(-|x|))
    bce = jnp.maximum(x, 0.0) - x * t + jnp.log1p(jnp.exp(-jnp.abs(x)))
    pt = jnp.exp(-bce)
    one_minus_pt = 1.0 - pt

    g = float(gamma)
    if g == 0.0:
        mod = jnp.ones_like(one_minus_pt)
    elif g.is_integer() and 0.0 < g <= 4.0:
        # small integer gamma (default gamma=2): plain multiplies, no pow
        mod = one_minus_pt
        for _ in range(int(g) - 1):
            mod = mod * one_minus_pt
    else:
        # generic float gamma: exp(g*log(.)) with a guard so pt == 1 gives 0
        safe = jnp.maximum(one_minus_pt, 1e-30)
        mod = jnp.where(one_minus_pt > 0.0, jnp.exp(g * jnp.log(safe)), 0.0)

    alpha_t = jnp.where(t == 1.0, alpha, 1.0 - alpha)
    return alpha_t * mod * bce


# --------------------------------------------------------------------------
# kernels
# --------------------------------------------------------------------------
def _focal_partial_sum_kernel(x_ref, t_ref, out_ref, *, alpha, gamma,
                              n_rows, mask_rows):
    """Per-block unweighted column sums of the focal loss -> (1, 1, C)."""
    focal = _focal_tile(x_ref[...], t_ref[...], alpha, gamma)
    tm, c = focal.shape
    if mask_rows:
        row = pl.program_id(0) * tm + lax.broadcasted_iota(jnp.int32, (tm, c), 0)
        focal = jnp.where(row < n_rows, focal, 0.0)
    out_ref[...] = jnp.sum(focal, axis=0, keepdims=True).reshape(1, 1, c)


def _focal_elementwise_kernel(x_ref, t_ref, w_ref, out_ref, *, alpha, gamma):
    """reduction='none': full weighted focal-loss map for this tile."""
    focal = _focal_tile(x_ref[...], t_ref[...], alpha, gamma)
    out_ref[...] = (focal * w_ref[...].astype(jnp.float32)).astype(out_ref.dtype)


# --------------------------------------------------------------------------
# wrapper
# --------------------------------------------------------------------------
def _round_up(x, m):
    return ((x + m - 1) // m) * m


def _choose_row_tile(n, c, bytes_per_elem_both, budget_bytes):
    # double-buffered (x, t) input tiles must fit the budget
    rows_budget = max(8, budget_bytes // (2 * c * bytes_per_elem_both))
    tm = min(1024, rows_budget, _round_up(n, 8))
    tm = max(8, (tm // 8) * 8)
    return tm


def multi_label_focal_loss_with_logits(inputs, targets, weight=None,
                                       alpha=0.5, gamma=2.0, reduction="mean",
                                       vmem_budget_bytes=8 * 1024 * 1024):
    """Pallas TPU fused multi-label focal loss (reductions: none/mean/sum)."""
    if inputs.shape != targets.shape:
        raise ValueError(
            f"Expected input shape {inputs.shape} to match target shape "
            f"{targets.shape}")
    if reduction not in ("none", "mean", "sum"):
        raise ValueError(f"Invalid reduction mode: {reduction}")

    orig_shape = inputs.shape
    c = int(orig_shape[-1])
    x2 = inputs.reshape(-1, c)
    t2 = targets.reshape(-1, c)
    n = int(x2.shape[0])

    itemsize_both = x2.dtype.itemsize + t2.dtype.itemsize
    tm = _choose_row_tile(n, c, itemsize_both, vmem_budget_bytes)
    n_pad = _round_up(n, tm)
    if n_pad != n:
        x2 = jnp.pad(x2, ((0, n_pad - n), (0, 0)))
        t2 = jnp.pad(t2, ((0, n_pad - n), (0, 0)))
    num_blocks = n_pad // tm

    compiler_params = pltpu.CompilerParams(
        dimension_semantics=("parallel",),
        vmem_limit_bytes=32 * 1024 * 1024,
    )

    if reduction == "none":
        if weight is None:
            w2 = jnp.ones((1, c), dtype=jnp.float32)
        else:
            w2 = jnp.broadcast_to(
                jnp.asarray(weight, dtype=jnp.float32).reshape(1, -1), (1, c))
        kernel = functools.partial(_focal_elementwise_kernel,
                                   alpha=float(alpha), gamma=float(gamma))
        out_full = pl.pallas_call(
            kernel,
            out_shape=jax.ShapeDtypeStruct((n_pad, c), jnp.float32),
            grid_spec=pltpu.PrefetchScalarGridSpec(
                num_scalar_prefetch=0,
                grid=(num_blocks,),
                in_specs=[
                    pl.BlockSpec((tm, c), lambda i: (i, 0)),   # logits tile
                    pl.BlockSpec((tm, c), lambda i: (i, 0)),   # targets tile
                    pl.BlockSpec((1, c), lambda i: (0, 0)),    # per-class weight
                ],
                out_specs=pl.BlockSpec((tm, c), lambda i: (i, 0)),
            ),
            compiler_params=compiler_params,
        )(x2, t2, w2)
        return out_full[:n].reshape(orig_shape)

    # ---- reduction in {'mean', 'sum'}: per-block column partial sums ----
    kernel = functools.partial(
        _focal_partial_sum_kernel,
        alpha=float(alpha), gamma=float(gamma),
        n_rows=n, mask_rows=(n_pad != n))

    partials = pl.pallas_call(
        kernel,
        out_shape=jax.ShapeDtypeStruct((num_blocks, 1, c), jnp.float32),
        grid_spec=pltpu.PrefetchScalarGridSpec(
            num_scalar_prefetch=0,
            grid=(num_blocks,),
            in_specs=[
                pl.BlockSpec((tm, c), lambda i: (i, 0)),   # logits tile
                pl.BlockSpec((tm, c), lambda i: (i, 0)),   # targets tile
            ],
            out_specs=pl.BlockSpec((1, 1, c), lambda i: (i, 0, 0)),
        ),
        compiler_params=compiler_params,
    )(x2, t2)

    # tiny epilogue in XLA: fold blocks, apply per-class weight, reduce
    col = jnp.sum(partials, axis=(0, 1))                 # (C,)
    if weight is not None:
        w = jnp.asarray(weight, dtype=jnp.float32).reshape(-1)
        total = jnp.sum(col * w)
    else:
        total = jnp.sum(col)

    if reduction == "mean":
        return total / jnp.float32(n * c)
    return total  # 'sum'


class MultiLabelFocalLossWithLogits:
    """JAX/Pallas port of the PyTorch module."""

    def __init__(self, weight=None, alpha=0.5, gamma=2.0, reduction="mean"):
        self.weight = weight
        self.alpha = alpha
        self.gamma = gamma
        self.reduction = reduction

    def __call__(self, inputs, targets):
        return multi_label_focal_loss_with_logits(
            inputs, targets, weight=self.weight,
            alpha=self.alpha, gamma=self.gamma, reduction=self.reduction)


# --------------------------------------------------------------------------
# pure-JAX reference
# --------------------------------------------------------------------------
def _reference(inputs, targets, weight, alpha, gamma, reduction):
    x = inputs.astype(jnp.float32)
    t = targets.astype(jnp.float32)
    bce = jnp.maximum(x, 0.0) - x * t + jnp.log1p(jnp.exp(-jnp.abs(x)))
    pt = jnp.exp(-bce)
    alpha_t = jnp.where(t == 1.0, alpha, 1.0 - alpha)
    fl = alpha_t * (1.0 - pt) ** gamma * bce
    if weight is not None:
        fl = fl * jnp.asarray(weight, dtype=jnp.float32)
    if reduction == "none":
        return fl
    if reduction == "mean":
        return jnp.mean(fl)
    return jnp.sum(fl)


if __name__ == "__main__":
    key = jax.random.PRNGKey(0)
    k1, k2, k3, k4 = jax.random.split(key, 4)

    # Small shapes consistent with the module: (batch, num_labels)
    N, C = 16, 128
    logits = jax.random.normal(k1, (N, C), dtype=jnp.float32) * 2.0
    targets = (jax.random.uniform(k2, (N, C)) > 0.5).astype(jnp.float32)
    weight = 0.5 + jnp.arange(C, dtype=jnp.float32) / C

    # reduction='mean' (module default)
    loss_mean = MultiLabelFocalLossWithLogits(
        weight=weight, alpha=0.5, gamma=2.0, reduction="mean")(logits, targets)
    loss_mean = jax.block_until_ready(loss_mean)
    ref_mean = _reference(logits, targets, weight, 0.5, 2.0, "mean")
    assert jnp.allclose(loss_mean, ref_mean, rtol=1e-5, atol=1e-5), (loss_mean, ref_mean)

    # reduction='sum'
    loss_sum = MultiLabelFocalLossWithLogits(
        weight=weight, alpha=0.5, gamma=2.0, reduction="sum")(logits, targets)
    loss_sum = jax.block_until_ready(loss_sum)
    ref_sum = _reference(logits, targets, weight, 0.5, 2.0, "sum")
    assert jnp.allclose(loss_sum, ref_sum, rtol=1e-5, atol=1e-3), (loss_sum, ref_sum)

    # reduction='none'
    loss_none = MultiLabelFocalLossWithLogits(
        weight=weight, alpha=0.5, gamma=2.0, reduction="none")(logits, targets)
    loss_none = jax.block_until_ready(loss_none)
    ref_none = _reference(logits, targets, weight, 0.5, 2.0, "none")
    assert jnp.allclose(loss_none, ref_none, rtol=1e-5, atol=1e-6)

    # ragged batch (N not a multiple of 8) exercises the in-kernel row mask
    Nr = 13
    logits_r = jax.random.normal(k3, (Nr, C), dtype=jnp.float32) * 2.0
    targets_r = (jax.random.uniform(k4, (Nr, C)) > 0.5).astype(jnp.float32)
    loss_r = MultiLabelFocalLossWithLogits(
        weight=None, alpha=0.25, gamma=2.0, reduction="mean")(logits_r, targets_r)
    loss_r = jax.block_until_ready(loss_r)
    ref_r = _reference(logits_r, targets_r, None, 0.25, 2.0, "mean")
    assert jnp.allclose(loss_r, ref_r, rtol=1e-5, atol=1e-5), (loss_r, ref_r)

    print("KERNEL_OK")
</pallas_src>

<mosaic_0001>
module attributes {stable_mosaic.version = 11 : i64} {
  func.func @_focal_partial_sum_kernel(%arg0: i32, %arg1: memref<16x128xf32, #tpu.memory_space<vmem>>, %arg2: memref<16x128xf32, #tpu.memory_space<vmem>>, %arg3: memref<1x1x128xf32, #tpu.memory_space<vmem>>) attributes {dimension_semantics = [#tpu.dimension_semantics<parallel>], iteration_bounds = array<i64: 1>, scalar_prefetch = 0 : i64, scratch_operands = 0 : i64, tpu.core_type = #tpu.core_type<tc>, window_params = [{transform_indices = @transform_0, window_bounds = array<i64: 16, 128>}, {transform_indices = @transform_1, window_bounds = array<i64: 16, 128>}, {transform_indices = @transform_2, window_bounds = array<i64: 1, 1, 128>}]} {
    %c0 = arith.constant 0 : index
    %c0_0 = arith.constant 0 : index
    %0 = vector.load %arg1[%c0, %c0_0] : memref<16x128xf32, #tpu.memory_space<vmem>>, vector<16x128xf32>
    %c0_1 = arith.constant 0 : index
    %c0_2 = arith.constant 0 : index
    %1 = vector.load %arg2[%c0_1, %c0_2] : memref<16x128xf32, #tpu.memory_space<vmem>>, vector<16x128xf32>
    %cst = arith.constant 0.000000e+00 : f32
    %2 = vector.broadcast %cst : f32 to vector<16x128xf32>
    %3 = arith.maximumf %0, %2 : vector<16x128xf32>
    %4 = arith.mulf %0, %1 : vector<16x128xf32>
    %5 = arith.subf %3, %4 : vector<16x128xf32>
    %6 = math.absf %0 : vector<16x128xf32>
    %cst_3 = arith.constant 0.000000e+00 : f32
    %7 = vector.broadcast %cst_3 : f32 to vector<16x128xf32>
    %8 = arith.subf %7, %6 : vector<16x128xf32>
    %9 = math.exp %8 : vector<16x128xf32>
    %10 = math.log1p %9 : vector<16x128xf32>
    %11 = arith.addf %5, %10 : vector<16x128xf32>
    %cst_4 = arith.constant 0.000000e+00 : f32
    %12 = vector.broadcast %cst_4 : f32 to vector<16x128xf32>
    %13 = arith.subf %12, %11 : vector<16x128xf32>
    %14 = math.exp %13 : vector<16x128xf32>
    %cst_5 = arith.constant 1.000000e+00 : f32
    %15 = vector.broadcast %cst_5 : f32 to vector<16x128xf32>
    %16 = arith.subf %15, %14 : vector<16x128xf32>
    %17 = arith.mulf %16, %16 : vector<16x128xf32>
    %cst_6 = arith.constant 1.000000e+00 : f32
    %18 = vector.broadcast %cst_6 : f32 to vector<16x128xf32>
    %19 = arith.cmpf oeq, %1, %18 : vector<16x128xf32>
    %cst_7 = arith.constant 5.000000e-01 : f32
    %cst_8 = arith.constant 5.000000e-01 : f32
    %20 = vector.broadcast %cst_7 : f32 to vector<16x128xf32>
    %21 = vector.broadcast %cst_8 : f32 to vector<16x128xf32>
    %22 = arith.select %19, %20, %21 : vector<16x128xi1>, vector<16x128xf32>
    %23 = arith.mulf %22, %17 : vector<16x128xf32>
    %24 = arith.mulf %23, %11 : vector<16x128xf32>
    %cst_9 = arith.constant dense<0.000000e+00> : vector<128xf32>
    %25 = vector.multi_reduction <add>, %24, %cst_9 [0] : vector<16x128xf32> to vector<128xf32>
    %26 = vector.shape_cast %25 : vector<128xf32> to vector<1x128xf32>
    %27 = vector.shape_cast %26 : vector<1x128xf32> to vector<1x1x128xf32>
    %c0_10 = arith.constant 0 : index
    %c0_11 = arith.constant 0 : index
    %c0_12 = arith.constant 0 : index
    %28 = vector.load %arg3[%c0_10, %c0_11, %c0_12] : memref<1x1x128xf32, #tpu.memory_space<vmem>>, vector<1x1x128xf32>
    tpu.vector_store %arg3[%c0_10, %c0_11, %c0_12], %27 {strides = array<i32>} : memref<1x1x128xf32, #tpu.memory_space<vmem>>, vector<1x1x128xf32>,
    return
  }
  func.func @transform_0(%arg0: i32) -> (i32, i32) {
    %c0_i32 = arith.constant 0 : i32
    %c0_i32_0 = arith.constant 0 : i32
    return %arg0, %c0_i32 : i32, i32
  }
  func.func @transform_1(%arg0: i32) -> (i32, i32) {
    %c0_i32 = arith.constant 0 : i32
    %c0_i32_0 = arith.constant 0 : i32
    return %arg0, %c0_i32 : i32, i32
  }
  func.func @transform_2(%arg0: i32) -> (i32, i32, i32) {
    %c0_i32 = arith.constant 0 : i32
    %c0_i32_0 = arith.constant 0 : i32
    %c0_i32_1 = arith.constant 0 : i32
    return %arg0, %c0_i32, %c0_i32_0 : i32, i32, i32
  }
}

</mosaic_0001>

<bundles_post_ra>
// kernel: tpu_custom_call.1
= control target key start
LH: loop header
LB: loop body
LE: loop exit
PB: predicated region body
PF: predicated region fallthrough
CT: control target
= control target key end

     0   :  { %7 = vsyncpa [#allocation3], 0  ;;  %s261_s0 = inlined_call_operand.hbm [shape: f32[16,128], index: 0, kind: input, shape index: {}]   ;;  %s262_s1 = inlined_call_operand.hbm [shape: f32[16,128], index: 1, kind: input, shape index: {}]   ;;  %s263_s2 = inlined_call_operand.hbm [shape: f32[1,1,128], index: 2, kind: output, shape index: {}]  }
   0x1   :  { %8 = vsyncpa [#allocation6], 0 }
   0x2   :  { %9 = vsyncpa [#allocation4], 0  ;;  %s205_s9 = smov [#allocation2]   ;;  %s133_s13 = scalar_lea.hbm %s261_s0, 256 }
   0x3   :  { %s15_s10 = sshll.u32 %s205_s9, 4  ;;  %p134_p0 = scmp.ne.s32.totalorder %s261_s0, %s133_s13  ;;  %s16_s10 = int_to_ptr.vmem [resolvable:$true] %s15_s10 }
   0x4   :  { %p137_p1 = scmp.lt.u32.totalorder %s133_s13, %s261_s0 }
   0x6   :  { %p139_p2 = pnand %p137_p1, %p134_p0 }
   0x8   :  { %142 = shalt.err (!%p139_p2)
}
   0x9   :  { %s143_s18 = scalar_lea.vmem %s16_s10, 256  ;;  %p148_p4 = scmp.lt.s32.totalorder %s16_s10, %s16_s10 }
   0xa   :  { %p144_p3 = scmp.ne.s32.totalorder %s16_s10, %s143_s18  ;;  %p149_p5 = scmp.lt.s32.totalorder %s143_s18, %s143_s18 }
   0xc   :  { %p150_p6 = por %p149_p5, %p148_p4 }
   0xe   :  { %p151_p7 = pnand %p150_p6, %p144_p3 }
  0x10   :  { %154 = shalt.err (!%p151_p7)
}
  0x11   :  { %s206_s19 = smov 128   ;;  %s207_s20 = smov 8  }
  0x12   :  { %21 = dma.hbm_to_vmem [thread:$0]  %s261_s0, 256, %s16_s10, [#allocation3], %s206_s19, %s206_s19, %s207_s20  }
  0x13   :  { %s208_s23 = smov [#allocation5]   ;;  %s155_s27 = scalar_lea.hbm %s262_s1, 256 }
  0x14   :  { %s27_s24 = sshll.u32 %s208_s23, 4  ;;  %p156_p8 = scmp.ne.s32.totalorder %s262_s1, %s155_s27  ;;  %s28_s24 = int_to_ptr.vmem [resolvable:$true] %s27_s24 }
  0x15   :  { %p159_p9 = scmp.lt.u32.totalorder %s155_s27, %s262_s1 }
  0x17   :  { %p161_p10 = pnand %p159_p9, %p156_p8 }
  0x19   :  { %164 = shalt.err (!%p161_p10)
}
  0x1a   :  { %s165_s4 = scalar_lea.vmem %s28_s24, 256  ;;  %p170_p12 = scmp.lt.s32.totalorder %s28_s24, %s28_s24 }
  0x1b   :  { %p166_p11 = scmp.ne.s32.totalorder %s28_s24, %s165_s4  ;;  %p171_p13 = scmp.lt.s32.totalorder %s165_s4, %s165_s4 }
  0x1d   :  { %p172_p0 = por %p171_p13, %p170_p12 }
  0x1f   :  { %p173_p1 = pnand %p172_p0, %p166_p11 }
  0x21   :  { %176 = shalt.err (!%p173_p1)
}
  0x22   :  { %33 = dma.hbm_to_vmem [thread:$0]  %s262_s1, 256, %s28_s24, [#allocation6], %s206_s19, %s206_s19, %s207_s20  }
  0x23   :  { %199 = dma.done.wait [#allocation3], 256  }
  0x24   :  { %200 = vsyncadd [#allocation3], 4294967040 }
  0x25   :  { %201 = dma.done.wait [#allocation6], 256  }
  0x26   :  { %202 = vsyncadd [#allocation6], 4294967040  ;;  %v40_v0 = vld [vmem:[#allocation2] sm:$0xff]  ;;  %v41_v1 = vld [vmem:[#allocation2 + $0x8] sm:$0xff]  ;;  %s209_s1 = smov [#allocation7]  }
  0x27   :  { %v50_v2 = vand.u32 2147483647, %v40_v0  ;;  %v51_v3 = vand.u32 2147483647, %v41_v1  ;;  %v42_v14 = vld [vmem:[#allocation5] sm:$0xff]  ;;  %v43_v15 = vld [vmem:[#allocation5 + $0x8] sm:$0xff] }
  0x28   :  { %v44_v17 = vmax.f32 %v40_v0, 0.0  ;;  %v46_v18 = vmul.f32 %v42_v14, %v40_v0  ;;  %v45_v21 = vmax.f32 %v41_v1, 0.0  ;;  %v47_v22 = vmul.f32 %v43_v15, %v41_v1  ;;  %s106_s6 = sshll.u32 %s209_s1, 4  ;;  %s107_s6 = int_to_ptr.vmem [resolvable:$true] %s106_s6 }
  0x29   :  { %v52_v4 = vsub.f32 0.0, %v50_v2  ;;  %v53_v5 = vsub.f32 0.0, %v51_v3  ;;  %s177_s7 = scalar_lea.vmem %s107_s6, 16  ;;  %s181_s8 = scalar_lea.vmem %s107_s6, 32 }
  0x2a   :  { %v48_v26 = vsub.f32 %v44_v17, %v46_v18  ;;  %v49_v29 = vsub.f32 %v45_v21, %v47_v22  ;;  %p178_p2 = scmp.ne.s32.totalorder %s107_s6, %s177_s7  ;;  %p182_p3 = scmp.lt.s32.totalorder %s107_s6, %s107_s6 }
  0x2b   :  { %v54_v6 = vmul.f32 1.442695, %v52_v4  ;;  %v56_v7 = vmul.f32 1.442695, %v53_v5  ;;  %p183_p4 = scmp.lt.s32.totalorder %s181_s8, %s177_s7 }
  0x2d   :  { %121 = vpow2.f32 %v54_v6  ;;  %p184_p5 = por %p183_p4, %p182_p3 }
  0x2e   :  { %123 = vpow2.f32 %v56_v7 }
  0x2f   :  { %p185_p6 = pnand %p184_p5, %p178_p2 }
  0x37   :  { %v122_v8 = vpop.eup %121 }
  0x38   :  { %v124_v9 = vpop.eup %123  ;;  %v58_v10 = vadd.f32 1.0, %v122_v8  ;;  %v61_v12 = vmul.f32 -0.5, %v122_v8  ;;  %v64_v19 = vand.u32 2147483647, %v122_v8 }
  0x39   :  { %v67_v11 = vadd.f32 1.0, %v124_v9  ;;  %v70_v13 = vmul.f32 -0.5, %v124_v9  ;;  %v73_v23 = vand.u32 2147483647, %v124_v9 }
  0x3a   :  { %125 = vlog2.f32 %v58_v10  ;;  %v62_v16 = vadd.f32 1.0, %v61_v12  ;;  %vm65_vm0 = vcmp.lt.f32.partialorder %v64_v19, 0.0004427343 }
  0x3b   :  { %127 = vlog2.f32 %v67_v11  ;;  %v71_v20 = vadd.f32 1.0, %v70_v13  ;;  %vm74_vm1 = vcmp.lt.f32.partialorder %v73_v23, 0.0004427343 }
  0x3c   :  { %v63_v24 = vmul.f32 %v122_v8, %v62_v16 }
  0x3d   :  { %v72_v27 = vmul.f32 %v124_v9, %v71_v20 }
  0x44   :  { %v126_v25 = vpop.eup %125 }
  0x45   :  { %v128_v28 = vpop.eup %127  ;;  %v60_v30 = vmul.f32 0.6931472, %v126_v25 }
  0x46   :  { %v69_v31 = vmul.f32 0.6931472, %v128_v28 }
  0x47   :  { %v66_v32 = vsel %vm65_vm0, %v63_v24, %v60_v30 }
  0x48   :  { %v75_v33 = vsel %vm74_vm1, %v72_v27, %v69_v31  ;;  %v76_v34 = vadd.f32 %v66_v32, %v48_v26 }
  0x49   :  { %v77_v35 = vadd.f32 %v75_v33, %v49_v29 }
  0x4a   :  { %v78_v36 = vsub.f32 0.0, %v76_v34 }
  0x4b   :  { %v79_v37 = vsub.f32 0.0, %v77_v35 }
  0x4c   :  { %v80_v38 = vmul.f32 1.442695, %v78_v36 }
  0x4d   :  { %v82_v39 = vmul.f32 1.442695, %v79_v37 }
  0x4e   :  { %129 = vpow2.f32 %v80_v38 }
  0x4f   :  { %131 = vpow2.f32 %v82_v39 }
  0x58   :  { %v130_v40 = vpop.eup %129 }
  0x59   :  { %v132_v41 = vpop.eup %131  ;;  %v84_v42 = vsub.f32 1.0, %v130_v40 }
  0x5a   :  { %v85_v43 = vsub.f32 1.0, %v132_v41 }
  0x5b   :  { %v86_v44 = vmul.f32 %v84_v42, %v84_v42 }
  0x5c   :  { %v87_v45 = vmul.f32 %v85_v43, %v85_v43 }
  0x5d   :  { %v88_v46 = vmul.f32 0.5, %v86_v44 }
  0x5e   :  { %v89_v47 = vmul.f32 0.5, %v87_v45 }
  0x5f   :  { %v90_v48 = vmul.f32 %v88_v46, %v76_v34 }
  0x60   :  { %v91_v49 = vmul.f32 %v89_v47, %v77_v35 }
  0x62   :  { %v92_v50 = vadd.f32 %v91_v49, %v90_v48 }
  0x64   :  { %v93_v51 = vrot.slane %v92_v50, 4 }
  0x66   :  { %v94_v52 = vadd.f32 %v93_v51, %v92_v50 }
  0x68   :  { %v95_v53 = vrot.slane %v94_v52, 2 }
  0x6a   :  { %v96_v54 = vadd.f32 %v95_v53, %v94_v52 }
  0x6c   :  { %v97_v55 = vrot.slane %v96_v54, 1 }
  0x6e   :  { %v98_v56 = vadd.f32 %v97_v55, %v96_v54 }
  0x70   :  { %99 = vst [vmem:[#allocation7] sm:$0x1] %v98_v56 }
  0x71   :  { %188 = shalt.err (!%p185_p6)
}
  0x72   :  { %s189_s11 = scalar_lea.hbm %s263_s2, 16 }
  0x73   :  { %p190_p7 = scmp.ne.s32.totalorder %s263_s2, %s189_s11  ;;  %p193_p8 = scmp.lt.u32.totalorder %s189_s11, %s263_s2 }
  0x75   :  { %p195_p9 = pnand %p193_p8, %p190_p7 }
  0x77   :  { %198 = shalt.err (!%p195_p9)
}
  0x78   :  { %109 = dma.vmem_to_hbm [thread:$0]  %s107_s6, 16, %s263_s2, [#allocation4]  }
  0x79   :  { %203 = dma.done.wait [#allocation4], 16  }
  0x7a   :  { %204 = vsyncadd [#allocation4], 4294967280 }
  0x7b   :  { %113 = vsyncpa [#allocation3], 1 }
  0x7c   :  { %114 = vsyncpa [#allocation6], 1 }
  0x7d   :  { %115 = vsyncpa [#allocation4], 1 }

</bundles_post_ra>
